<compile_context>
chip_gen: v6e
topology: v6e:2x2x1
jax: 0.10.0
libtpu: 0.0.40
codegen_flags: <defaults>
</compile_context>

<pallas_src>
import jax
import jax.numpy as jnp
from jax.experimental import pallas as pl
from jax.experimental.pallas import tpu as pltpu


def _copy_kernel(x_ref, o_ref):
    # Pure lane-dense copy of one VMEM tile; the flatten itself is done
    # (for free) by the wrapper's reshape.
    o_ref[...] = x_ref[...]


def _sublane_align(dtype) -> int:
    # Sublane packing: 8 rows for 32-bit, 16 for 16-bit, 32 for 8-bit dtypes.
    return {4: 8, 2: 16, 1: 32}.get(jnp.dtype(dtype).itemsize, 8)


def _largest_dividing_multiple(value: int, base: int, cap: int) -> int:
    """Largest multiple of `base` that divides `value` and is <= cap (0 if none)."""
    best = 0
    m = base
    limit = min(value, cap)
    while m <= limit:
        if value % m == 0:
            best = m
        m += base
    return best


_PER_BUFFER_CAP_BYTES = 3 * 1024 * 1024  # ~3 MiB/buffer -> <=12 MiB double-buffered


def flatten(feat: jax.Array) -> jax.Array:
    """Pallas equivalent of Flatten.forward: (N, ...) -> (N, prod(rest))."""
    n = feat.shape[0]
    flat = 1
    for d in feat.shape[1:]:
        flat *= d
    total = n * flat
    dtype = feat.dtype
    itemsize = jnp.dtype(dtype).itemsize
    sub = _sublane_align(dtype)

    # The actual flatten: a free, metadata-only reshape done in the wrapper.
    feat2d = feat.reshape(n, flat)

    cost = pl.CostEstimate(flops=0, transcendentals=0,
                           bytes_accessed=2 * total * itemsize)

    # ---- choose a lane-dense (R, W) copy view --------------------------------
    # Prefer the largest W (multiple of 128) dividing `total` such that
    # R = total // W is sublane-aligned; else any 128-multiple divisor.
    lane_candidates = (2048, 1024, 512, 256, 128)
    W = 0
    for cand in lane_candidates:
        if total % cand == 0 and (total // cand) % sub == 0:
            W = cand
            break
    if W == 0:
        for cand in lane_candidates:
            if total % cand == 0:
                W = cand
                break

    if W == 0:
        # Element count not a multiple of 128: tiny/awkward array -> one full
        # block (block dims equal to full array dims are always legal).
        # TODO(synk): very large arrays with total % 128 != 0 would need a
        # padded copy path; irrelevant for this module's shapes.
        out = pl.pallas_call(
            _copy_kernel,
            out_shape=jax.ShapeDtypeStruct((n, flat), dtype),
            in_specs=[pl.BlockSpec((n, flat), lambda: (0, 0))],
            out_specs=pl.BlockSpec((n, flat), lambda: (0, 0)),
            cost_estimate=cost,
        )(feat2d)
        return out

    R = total // W
    view = feat2d.reshape(R, W)  # order-preserving re-view, still free

    # ---- choose the row tile --------------------------------------------------
    row_cap = max(_PER_BUFFER_CAP_BYTES // (W * itemsize), 1)
    # Guarantee >= 2 row blocks on large arrays so both v7x TensorCores stream.
    if R >= 2 * sub:
        row_cap = min(row_cap, max(R // 2, sub))
    tn = _largest_dividing_multiple(R, sub, row_cap)
    if tn > 0:
        grid = (R // tn,)
    else:
        # No sublane-aligned divisor under the cap: use a cdiv grid; the
        # (possibly partial, masked) last block is still a correct copy.
        tn = min(R, max(row_cap - row_cap % sub, sub))
        grid = (pl.cdiv(R, tn),)

    out = pl.pallas_call(
        _copy_kernel,
        out_shape=jax.ShapeDtypeStruct((R, W), dtype),
        grid_spec=pltpu.PrefetchScalarGridSpec(
            num_scalar_prefetch=0,
            grid=grid,
            in_specs=[pl.BlockSpec((tn, W), lambda i: (i, 0))],
            out_specs=pl.BlockSpec((tn, W), lambda i: (i, 0)),
        ),
        compiler_params=pltpu.CompilerParams(
            dimension_semantics=("parallel",),
        ),
        cost_estimate=cost,
    )(view)

    return out.reshape(n, flat)


if __name__ == "__main__":
    key = jax.random.PRNGKey(0)
    # NCHW input, small shapes: batch=2, channels=4, spatial=16x16
    x = jax.random.normal(key, (2, 4, 16, 16), dtype=jnp.float32)

    y = flatten(x)
    y = jax.block_until_ready(y)

    # Reference: plain JAX reshape (matches torch .view on contiguous NCHW).
    y_ref = x.reshape(x.shape[0], -1)

    assert y.shape == (2, 4 * 16 * 16), y.shape
    assert y.dtype == x.dtype
    assert jnp.array_equal(y, y_ref), "mismatch vs reference reshape"

    print("KERNEL_OK")
</pallas_src>

<mosaic_0001>
module attributes {stable_mosaic.version = 11 : i64} {
  func.func @_copy_kernel(%arg0: i32, %arg1: memref<8x256xf32, #tpu.memory_space<vmem>>, %arg2: memref<8x256xf32, #tpu.memory_space<vmem>>) attributes {dimension_semantics = [#tpu.dimension_semantics<parallel>], iteration_bounds = array<i64: 1>, scalar_prefetch = 0 : i64, scratch_operands = 0 : i64, tpu.core_type = #tpu.core_type<tc>, window_params = [{transform_indices = @transform_0, window_bounds = array<i64: 8, 256>}, {transform_indices = @transform_1, window_bounds = array<i64: 8, 256>}]} {
    %c0 = arith.constant 0 : index
    %c0_0 = arith.constant 0 : index
    %0 = vector.load %arg1[%c0, %c0_0] : memref<8x256xf32, #tpu.memory_space<vmem>>, vector<8x256xf32>
    %c0_1 = arith.constant 0 : index
    %c0_2 = arith.constant 0 : index
    %1 = vector.load %arg2[%c0_1, %c0_2] : memref<8x256xf32, #tpu.memory_space<vmem>>, vector<8x256xf32>
    tpu.vector_store %arg2[%c0_1, %c0_2], %0 {strides = array<i32>} : memref<8x256xf32, #tpu.memory_space<vmem>>, vector<8x256xf32>,
    return
  }
  func.func @transform_0(%arg0: i32) -> (i32, i32) {
    %c0_i32 = arith.constant 0 : i32
    %c0_i32_0 = arith.constant 0 : i32
    return %arg0, %c0_i32 : i32, i32
  }
  func.func @transform_1(%arg0: i32) -> (i32, i32) {
    %c0_i32 = arith.constant 0 : i32
    %c0_i32_0 = arith.constant 0 : i32
    return %arg0, %c0_i32 : i32, i32
  }
}

</mosaic_0001>

<bundles_post_ra>
// kernel: tpu_custom_call.1
= control target key start
LH: loop header
LB: loop body
LE: loop exit
PB: predicated region body
PF: predicated region fallthrough
CT: control target
= control target key end

     0   :  { %6 = vsyncpa [#allocation3], 0  ;;  %s104_s0 = inlined_call_operand.hbm [shape: f32[8,256], index: 0, kind: input, shape index: {}]   ;;  %s105_s1 = inlined_call_operand.hbm [shape: f32[8,256], index: 1, kind: output, shape index: {}]  }
   0x1   :  { %7 = vsyncpa [#allocation4], 0  ;;  %s86_s6 = smov [#allocation2]  }
   0x2   :  { %s14_s7 = sshll.u32 %s86_s6, 4  ;;  %s15_s7 = int_to_ptr.vmem [resolvable:$true] %s14_s7 }
   0x3   :  { %s50_s8 = scalar_lea.vmem %s15_s7, 256  ;;  %p55_p1 = scmp.lt.s32.totalorder %s15_s7, %s15_s7 }
   0x4   :  { %p51_p0 = scmp.ne.s32.totalorder %s15_s7, %s50_s8  ;;  %p56_p2 = scmp.lt.s32.totalorder %s50_s8, %s50_s8 }
   0x6   :  { %p57_p3 = por %p56_p2, %p55_p1 }
   0x8   :  { %p58_p4 = pnand %p57_p3, %p51_p0 }
   0xa   :  { %61 = shalt.err (!%p58_p4)
}
   0xb   :  { %17 = dma.hbm_to_vmem [thread:$0]  %s104_s0, 256, %s15_s7, [#allocation3]  }
   0xc   :  { %82 = dma.done.wait [#allocation3], 256  }
   0xd   :  { %83 = vsyncadd [#allocation3], 4294967040  ;;  %s87_s11 = smov [#allocation5]   ;;  %v21_v0 = vld [vmem:[#allocation2] sm:$0xff]  ;;  %v22_v1 = vld [vmem:[#allocation2 + $0x8] sm:$0xff] }
   0xe   :  { %s31_s12 = sshll.u32 %s87_s11, 4  ;;  %23 = vst [vmem:[#allocation5] sm:$0xff] %v21_v0  ;;  %24 = vst [vmem:[#allocation5 + $0x8] sm:$0xff] %v22_v1  ;;  %s32_s12 = int_to_ptr.vmem [resolvable:$true] %s31_s12 }
   0xf   :  { %s62_s13 = scalar_lea.vmem %s32_s12, 256  ;;  %p67_p6 = scmp.lt.s32.totalorder %s32_s12, %s32_s12 }
  0x10   :  { %p63_p5 = scmp.ne.s32.totalorder %s32_s12, %s62_s13  ;;  %p68_p7 = scmp.lt.s32.totalorder %s62_s13, %s62_s13 }
  0x12   :  { %p69_p8 = por %p68_p7, %p67_p6 }
  0x14   :  { %p70_p9 = pnand %p69_p8, %p63_p5 }
  0x16   :  { %73 = shalt.err (!%p70_p9)
}
  0x17   :  { %34 = dma.vmem_to_hbm [thread:$0]  %s32_s12, 256, %s105_s1, [#allocation4]  }
  0x18   :  { %84 = dma.done.wait [#allocation4], 256  }
  0x19   :  { %85 = vsyncadd [#allocation4], 4294967040 }
  0x1a   :  { %38 = vsyncpa [#allocation3], 1 }
  0x1b   :  { %39 = vsyncpa [#allocation4], 1 }

</bundles_post_ra>
